<compile_context>
chip_gen: v7x
topology: tpu7x:2x2x1
jax: 0.10.0
libtpu: 0.0.40
codegen_flags: <defaults>
</compile_context>

<pallas_src>
import jax
import jax.numpy as jnp
from jax.experimental import pallas as pl
from jax.experimental.pallas import tpu as pltpu


def _round_up(x, m):
    return ((x + m - 1) // m) * m


# ------------------- kernel 1: fused patch-embed + encoder + mean_stack + head ------------------- #

def _encoder_head_kernel(x_ref, wp_ref, bp_ref, we_ref, be_ref, wh_ref, bh_ref, o_ref):
    # x_ref: (KP, TM) bf16, tokens (patches) on the 128-lane axis.
    x = x_ref[...]
    h = jnp.dot(wp_ref[...], x, preferred_element_type=jnp.float32) + bp_ref[...]      # (D, TM) f32

    num_layers = we_ref.shape[0]
    feats = []
    for l in range(num_layers):            # static unroll; weights are grid-invariant, stay in VMEM
        h = jnp.tanh(jnp.dot(we_ref[l], h.astype(jnp.bfloat16),
                             preferred_element_type=jnp.float32) + be_ref[l])
        feats.append(h)

    # stacking_fn = mean_stack over encoder slices [(0, 2), (2, 4)]
    f0 = ((feats[0] + feats[1]) * 0.5).astype(jnp.bfloat16)
    f1 = ((feats[2] + feats[3]) * 0.5).astype(jnp.bfloat16)

    # decoder head as two half-matmuls accumulated in f32 (no (2D, TM) concat buffer in VMEM)
    acc = jnp.dot(wh_ref[0], f0, preferred_element_type=jnp.float32)
    acc = acc + jnp.dot(wh_ref[1], f1, preferred_element_type=jnp.float32)
    o_ref[...] = acc + bh_ref[...]         # (CH=8, TM) f32, lane-dense + full-sublane store


def encoder_head_fused(patches_t, params, tm):
    KP, Mp = patches_t.shape
    D = params["w_patch_t"].shape[0]
    L = params["w_enc_t"].shape[0]
    CH = params["w_head_t"].shape[1]       # padded to 8 channels
    return pl.pallas_call(
        _encoder_head_kernel,
        out_shape=jax.ShapeDtypeStruct((CH, Mp), jnp.float32),
        grid_spec=pltpu.PrefetchScalarGridSpec(
            num_scalar_prefetch=0,
            grid=(Mp // tm,),
            in_specs=[
                pl.BlockSpec((KP, tm), lambda i: (0, i)),
                pl.BlockSpec((D, KP), lambda i: (0, 0)),
                pl.BlockSpec((D, 1), lambda i: (0, 0)),
                pl.BlockSpec((L, D, D), lambda i: (0, 0, 0)),
                pl.BlockSpec((L, D, 1), lambda i: (0, 0, 0)),
                pl.BlockSpec((2, CH, D), lambda i: (0, 0, 0)),
                pl.BlockSpec((CH, 1), lambda i: (0, 0)),
            ],
            out_specs=pl.BlockSpec((CH, tm), lambda i: (0, i)),
        ),
        compiler_params=pltpu.CompilerParams(dimension_semantics=("parallel",)),
    )(patches_t, params["w_patch_t"], params["b_patch"],
      params["w_enc_t"], params["b_enc"],
      params["w_head_t"], params["b_head"])


# -------------- kernel 2: nearest upsample + points / rays / confidence / radius -------------- #

def _points_kernel(head_ref, e_ref, bigr_ref, pts_ref, rays_ref, conf_ref, rad_ref):
    # head_ref: (1, 1, 5*hp_blk, Wp) f32  patch-resolution slab, channels stacked major
    # e_ref:    (Wp, W_pad)               0/1 column-expansion (bf16, exact)
    # bigr_ref: (5*rows_blk, 5*hp_blk)    block-diag 0/1 row-expansion (bf16, exact)
    rows_blk = pts_ref.shape[2]

    # TODO(synk): head values are rounded to bf16 for the selection matmuls; keep an f32 path for
    # log_radius if production precision requires it.
    hb = head_ref[0, 0].astype(jnp.bfloat16)                                     # (5*hp_blk, Wp)
    col = jnp.dot(hb, e_ref[...], preferred_element_type=jnp.float32)            # (5*hp_blk, W_pad)
    up = jnp.dot(bigr_ref[...], col.astype(jnp.bfloat16),
                 preferred_element_type=jnp.float32)                             # (5*rows_blk, W_pad)

    r0 = up[0 * rows_blk:1 * rows_blk]
    r1 = up[1 * rows_blk:2 * rows_blk]
    r2 = up[2 * rows_blk:3 * rows_blk]
    log_rad = up[3 * rows_blk:4 * rows_blk]
    conf_logit = up[4 * rows_blk:5 * rows_blk]

    # clamp keeps exp finite / positive with arbitrary decoder weights
    radius = jnp.exp(jnp.clip(log_rad, -80.0, 80.0))                             # EUP
    # numerically stable sigmoid via tanh (EUP); clamp keeps it strictly inside (0, 1) in f32
    conf = 0.5 * (jnp.tanh(0.5 * jnp.clip(conf_logit, -15.0, 15.0)) + 1.0)

    # pts_3d = rays * radius ; depth = pts_3d[:, -1:] is derived in the wrapper (no extra plane写)
    pts_ref[0, 0] = r0 * radius
    pts_ref[0, 1] = r1 * radius
    pts_ref[0, 2] = r2 * radius

    # forward_test: rays / ||rays||.clip(min=1e-5)
    sq = r0 * r0 + r1 * r1 + r2 * r2
    inv_norm = jax.lax.rsqrt(jnp.maximum(sq, 1e-10))   # == 1 / max(sqrt(sq), 1e-5)
    rays_ref[0, 0] = r0 * inv_norm
    rays_ref[0, 1] = r1 * inv_norm
    rays_ref[0, 2] = r2 * inv_norm

    conf_ref[0, 0] = conf
    rad_ref[0, 0] = radius


def _choose_hp_blk(Hp, patch, W_pad, budget_bytes=24 << 20, cap=32):
    """Patch-rows per grid step.  cap=32 is v7x-safe; sweep up to 64 on v5e/v6e if desired."""
    def out_bytes(d):                       # double-buffered full-res output bytes per step
        return 2 * 8 * d * patch * W_pad * 4

    # 1) largest multiple-of-8 divisor of Hp within cap and budget
    best = 0
    for d in range(8, min(Hp, cap) + 1, 8):
        if Hp % d == 0 and out_bytes(d) <= budget_bytes:
            best = d
    if best:
        return best, Hp
    # 2) small heights: take the whole (small) height -> block dim equals full array dim (legal)
    if Hp <= cap and out_bytes(Hp) <= budget_bytes:
        return Hp, Hp
    # 3) pathological Hp: pad to a multiple of 8 and tile with a fitting multiple of 8
    Hp_pad = _round_up(Hp, 8)
    for d in (32, 24, 16, 8):
        if d <= cap and Hp_pad % d == 0 and out_bytes(d) <= budget_bytes:
            return d, Hp_pad
    return 8, _round_up(Hp, 8)


def points_from_head(head_cbhw, patch, H, W):
    """head_cbhw: (CH>=5, B, Hp, Wp) f32 -> (points, rays_n, confidence, radius) at (H, W)."""
    CH, B, Hp, Wp = head_cbhw.shape
    assert CH >= 5 and Hp * patch == H and Wp * patch == W

    W_pad = _round_up(W, 128)                     # lane-dense (unmasked) full-res stores
    hp_blk, Hp_pad = _choose_hp_blk(Hp, patch, W_pad)
    rows_blk = hp_blk * patch
    H_pad = Hp_pad * patch
    n_rb = Hp_pad // hp_blk

    # tiny patch-resolution re-arrangement: per (batch, row-block) slab of shape (5*hp_blk, Wp)
    head5 = head_cbhw[:5]
    if Hp_pad != Hp:
        head5 = jnp.pad(head5, ((0, 0), (0, 0), (0, Hp_pad - Hp), (0, 0)))
    head_blk = (head5.reshape(5, B, n_rb, hp_blk, Wp)
                .transpose(1, 2, 0, 3, 4)
                .reshape(B, n_rb, 5 * hp_blk, Wp))

    # exact 0/1 nearest-upsample matrices (bf16 -> single-pass MXU)
    E = (jnp.arange(W_pad)[None, :] // patch
         == jnp.arange(Wp)[:, None]).astype(jnp.bfloat16)                        # (Wp, W_pad)
    R = (jnp.arange(rows_blk)[:, None] // patch
         == jnp.arange(hp_blk)[None, :]).astype(jnp.float32)                     # (rows_blk, hp_blk)
    BigR = jnp.kron(jnp.eye(5, dtype=jnp.float32), R).astype(jnp.bfloat16)       # block-diag

    out_shapes = (
        jax.ShapeDtypeStruct((B, 3, H_pad, W_pad), jnp.float32),   # points
        jax.ShapeDtypeStruct((B, 3, H_pad, W_pad), jnp.float32),   # normalized rays
        jax.ShapeDtypeStruct((B, 1, H_pad, W_pad), jnp.float32),   # confidence
        jax.ShapeDtypeStruct((B, 1, H_pad, W_pad), jnp.float32),   # radius
    )

    pts, rays, conf, rad = pl.pallas_call(
        _points_kernel,
        out_shape=out_shapes,
        grid_spec=pltpu.PrefetchScalarGridSpec(
            num_scalar_prefetch=0,
            grid=(B, n_rb),
            in_specs=[
                pl.BlockSpec((1, 1, 5 * hp_blk, Wp), lambda b, r: (b, r, 0, 0)),
                pl.BlockSpec((Wp, W_pad), lambda b, r: (0, 0)),
                pl.BlockSpec((5 * rows_blk, 5 * hp_blk), lambda b, r: (0, 0)),
            ],
            out_specs=[
                pl.BlockSpec((1, 3, rows_blk, W_pad), lambda b, r: (b, 0, r, 0)),
                pl.BlockSpec((1, 3, rows_blk, W_pad), lambda b, r: (b, 0, r, 0)),
                pl.BlockSpec((1, 1, rows_blk, W_pad), lambda b, r: (b, 0, r, 0)),
                pl.BlockSpec((1, 1, rows_blk, W_pad), lambda b, r: (b, 0, r, 0)),
            ],
        ),
        compiler_params=pltpu.CompilerParams(
            dimension_semantics=("parallel", "parallel"),
            vmem_limit_bytes=48 << 20,     # > hp_blk budget, < v7x 64 MiB physical
        ),
    )(head_blk, E, BigR)

    return (pts[:, :, :H, :W], rays[:, :, :H, :W],
            conf[:, :, :H, :W], rad[:, :, :H, :W])


# ------------------------- parameters (deterministic, synthetic) ------------------------- #

def init_params(key, in_ch=3, patch=4, embed_dim=32, num_layers=4, head_out=5, head_pad=8):
    # TODO(synk): the real DINO pixel_encoder (attention blocks, cls tokens) and Decoder
    # (camera/depth transformer heads) are external modules; this linear/tanh stack stands in.
    assert num_layers == 4
    ks = jax.random.split(key, 3)
    scale = 0.1
    kp = in_ch * patch * patch
    p = {}
    p["w_patch_t"] = (scale * jax.random.normal(ks[0], (embed_dim, kp), jnp.float32)
                      ).astype(jnp.bfloat16)
    p["b_patch"] = jnp.zeros((embed_dim, 1), jnp.float32)
    p["w_enc_t"] = (scale * jax.random.normal(ks[1], (num_layers, embed_dim, embed_dim),
                                              jnp.float32)).astype(jnp.bfloat16)
    p["b_enc"] = jnp.zeros((num_layers, embed_dim, 1), jnp.float32)
    wh = scale * jax.random.normal(ks[2], (head_out, 2 * embed_dim), jnp.float32)
    wh = jnp.pad(wh, ((0, head_pad - head_out), (0, 0)))          # pad channels 5..7 with zeros
    p["w_head_t"] = jnp.stack([wh[:, :embed_dim], wh[:, embed_dim:]], axis=0).astype(jnp.bfloat16)
    p["b_head"] = jnp.zeros((head_pad, 1), jnp.float32)
    return p


# ------------------------------------ forward pass ------------------------------------ #

def unidepthv2_forward(image, params, patch=4):
    """image: (B, 3, H, W) NCHW float32, like the PyTorch module."""
    B, C, H, W = image.shape
    Hp, Wp = H // patch, W // patch
    M = B * Hp * Wp
    KP = C * patch * patch

    # im2col directly into (features, tokens) layout: tokens on the 128-lane axis,
    # token order m = (b, hp, wp) row-major (so the head reshape below is a pure reshape).
    x = image.reshape(B, C, Hp, patch, Wp, patch)
    x = x.transpose(1, 3, 5, 0, 2, 4)                        # (C, p, p, B, Hp, Wp)
    patches_t = x.reshape(KP, M).astype(jnp.bfloat16)

    TM = min(2048, _round_up(M, 128))                        # big token tiles, cheap per-step overhead
    Mp = _round_up(M, TM)
    if Mp != M:
        patches_t = jnp.pad(patches_t, ((0, 0), (0, Mp - M)))

    # fused: patch embed -> 4x (linear + tanh) -> mean_stack pairs -> head, all VMEM-resident
    head_t = encoder_head_fused(patches_t, params, TM)       # (8, Mp) f32, lane-dense

    CH = head_t.shape[0]
    head = head_t[:, :M].reshape(CH, B, Hp, Wp)              # pure reshape (no transpose)

    # fused: nearest upsample (patch->pixel) + exp/sigmoid + points + ray normalization
    points, rays_n, confidence, radius = points_from_head(head, patch, H, W)
    depth = points[:, -1:]                                   # alias of the z channel

    # TODO(synk): match_gt / match_intrinsics / _postprocess (bilinear resize + pad crop) need
    # ground-truth shapes and external Camera ops; not representable here.
    return {
        "points": points,
        "depth": depth,
        "rays": rays_n,
        "confidence": confidence,
        "radius": radius,
    }


# ---------------------------------------- main ---------------------------------------- #

if __name__ == "__main__":
    key = jax.random.PRNGKey(0)
    k_img, k_par = jax.random.split(key)

    B, C, H, W = 2, 3, 16, 16
    image = jax.random.normal(k_img, (B, C, H, W), dtype=jnp.float32)
    params = init_params(k_par)

    out = jax.jit(unidepthv2_forward)(image, params)
    out = jax.block_until_ready(out)

    assert out["points"].shape == (B, 3, H, W)
    assert out["depth"].shape == (B, 1, H, W)
    assert out["rays"].shape == (B, 3, H, W)
    assert out["confidence"].shape == (B, 1, H, W)
    assert out["radius"].shape == (B, 1, H, W)
    # depth must equal the last channel of points
    assert bool(jnp.allclose(out["depth"][:, 0], out["points"][:, -1]))
    # normalized rays must have unit norm over the channel dim
    norms = jnp.sqrt(jnp.sum(out["rays"] ** 2, axis=1))
    assert bool(jnp.allclose(norms, 1.0, atol=1e-4))
    # radius positive, confidence strictly inside (0, 1)
    assert bool(jnp.all(out["radius"] > 0))
    assert bool(jnp.all((out["confidence"] > 0) & (out["confidence"] < 1)))

    print("KERNEL_OK")
</pallas_src>

<mosaic_0001>
module attributes {stable_mosaic.version = 11 : i64} {
  func.func @_encoder_head_kernel(%arg0: i32, %arg1: memref<48x128xbf16, #tpu.memory_space<vmem>>, %arg2: memref<32x48xbf16, #tpu.memory_space<vmem>>, %arg3: memref<32x1xf32, #tpu.memory_space<vmem>>, %arg4: memref<4x32x32xbf16, #tpu.memory_space<vmem>>, %arg5: memref<4x32x1xf32, #tpu.memory_space<vmem>>, %arg6: memref<2x8x32xbf16, #tpu.memory_space<vmem>>, %arg7: memref<8x1xf32, #tpu.memory_space<vmem>>, %arg8: memref<8x128xf32, #tpu.memory_space<vmem>>) attributes {dimension_semantics = [#tpu.dimension_semantics<parallel>], iteration_bounds = array<i64: 1>, scalar_prefetch = 0 : i64, scratch_operands = 0 : i64, tpu.core_type = #tpu.core_type<tc>, window_params = [{transform_indices = @transform_0, window_bounds = array<i64: 48, 128>}, {pipeline_mode = #tpu.pipeline_mode<synchronous>, transform_indices = @transform_1, window_bounds = array<i64: 32, 48>}, {pipeline_mode = #tpu.pipeline_mode<synchronous>, transform_indices = @transform_2, window_bounds = array<i64: 32, 1>}, {pipeline_mode = #tpu.pipeline_mode<synchronous>, transform_indices = @transform_3, window_bounds = array<i64: 4, 32, 32>}, {pipeline_mode = #tpu.pipeline_mode<synchronous>, transform_indices = @transform_4, window_bounds = array<i64: 4, 32, 1>}, {pipeline_mode = #tpu.pipeline_mode<synchronous>, transform_indices = @transform_5, window_bounds = array<i64: 2, 8, 32>}, {pipeline_mode = #tpu.pipeline_mode<synchronous>, transform_indices = @transform_6, window_bounds = array<i64: 8, 1>}, {transform_indices = @transform_7, window_bounds = array<i64: 8, 128>}]} {
    %c0 = arith.constant 0 : index
    %c0_0 = arith.constant 0 : index
    %0 = vector.load %arg1[%c0, %c0_0] : memref<48x128xbf16, #tpu.memory_space<vmem>>, vector<48x128xbf16>
    %c0_1 = arith.constant 0 : index
    %c0_2 = arith.constant 0 : index
    %1 = vector.load %arg2[%c0_1, %c0_2] : memref<32x48xbf16, #tpu.memory_space<vmem>>, vector<32x48xbf16>
    %cst = arith.constant dense<0.000000e+00> : vector<32x128xf32>
    %2 = tpu.matmul %1, %0, %cst {dimension_numbers = #tpu.dot_dimension_numbers<[1], [0], [0], [1], [0, 0, 1, 1], [], []>} : vector<32x48xbf16>, vector<48x128xbf16>, vector<32x128xf32> -> vector<32x128xf32>
    %c0_3 = arith.constant 0 : index
    %c0_4 = arith.constant 0 : index
    %3 = vector.load %arg3[%c0_3, %c0_4] : memref<32x1xf32, #tpu.memory_space<vmem>>, vector<32x1xf32>
    %4 = vector.broadcast %3 : vector<32x1xf32> to vector<32x128xf32>
    %5 = arith.addf %2, %4 : vector<32x128xf32>
    %c0_5 = arith.constant 0 : index
    %c0_6 = arith.constant 0 : index
    %c0_7 = arith.constant 0 : index
    %6 = vector.load %arg4[%c0_5, %c0_6, %c0_7] : memref<4x32x32xbf16, #tpu.memory_space<vmem>>, vector<1x32x32xbf16>
    %7 = vector.shape_cast %6 : vector<1x32x32xbf16> to vector<32x32xbf16>
    %8 = arith.truncf %5 : vector<32x128xf32> to vector<32x128xbf16>
    %cst_8 = arith.constant dense<0.000000e+00> : vector<32x128xf32>
    %9 = tpu.matmul %7, %8, %cst_8 {dimension_numbers = #tpu.dot_dimension_numbers<[1], [0], [0], [1], [0, 0, 1, 1], [], []>} : vector<32x32xbf16>, vector<32x128xbf16>, vector<32x128xf32> -> vector<32x128xf32>
    %c0_9 = arith.constant 0 : index
    %c0_10 = arith.constant 0 : index
    %c0_11 = arith.constant 0 : index
    %10 = vector.load %arg5[%c0_9, %c0_10, %c0_11] : memref<4x32x1xf32, #tpu.memory_space<vmem>>, vector<1x32x1xf32>
    %11 = vector.shape_cast %10 : vector<1x32x1xf32> to vector<32x1xf32>
    %12 = vector.broadcast %11 : vector<32x1xf32> to vector<32x128xf32>
    %13 = arith.addf %9, %12 : vector<32x128xf32>
    %14 = math.tanh %13 : vector<32x128xf32>
    %c1 = arith.constant 1 : index
    %c0_12 = arith.constant 0 : index
    %c0_13 = arith.constant 0 : index
    %15 = vector.load %arg4[%c1, %c0_12, %c0_13] : memref<4x32x32xbf16, #tpu.memory_space<vmem>>, vector<1x32x32xbf16>
    %16 = vector.shape_cast %15 : vector<1x32x32xbf16> to vector<32x32xbf16>
    %17 = arith.truncf %14 : vector<32x128xf32> to vector<32x128xbf16>
    %cst_14 = arith.constant dense<0.000000e+00> : vector<32x128xf32>
    %18 = tpu.matmul %16, %17, %cst_14 {dimension_numbers = #tpu.dot_dimension_numbers<[1], [0], [0], [1], [0, 0, 1, 1], [], []>} : vector<32x32xbf16>, vector<32x128xbf16>, vector<32x128xf32> -> vector<32x128xf32>
    %c1_15 = arith.constant 1 : index
    %c0_16 = arith.constant 0 : index
    %c0_17 = arith.constant 0 : index
    %19 = vector.load %arg5[%c1_15, %c0_16, %c0_17] : memref<4x32x1xf32, #tpu.memory_space<vmem>>, vector<1x32x1xf32>
    %20 = vector.shape_cast %19 : vector<1x32x1xf32> to vector<32x1xf32>
    %21 = vector.broadcast %20 : vector<32x1xf32> to vector<32x128xf32>
    %22 = arith.addf %18, %21 : vector<32x128xf32>
    %23 = math.tanh %22 : vector<32x128xf32>
    %c2 = arith.constant 2 : index
    %c0_18 = arith.constant 0 : index
    %c0_19 = arith.constant 0 : index
    %24 = vector.load %arg4[%c2, %c0_18, %c0_19] : memref<4x32x32xbf16, #tpu.memory_space<vmem>>, vector<1x32x32xbf16>
    %25 = vector.shape_cast %24 : vector<1x32x32xbf16> to vector<32x32xbf16>
    %26 = arith.truncf %23 : vector<32x128xf32> to vector<32x128xbf16>
    %cst_20 = arith.constant dense<0.000000e+00> : vector<32x128xf32>
    %27 = tpu.matmul %25, %26, %cst_20 {dimension_numbers = #tpu.dot_dimension_numbers<[1], [0], [0], [1], [0, 0, 1, 1], [], []>} : vector<32x32xbf16>, vector<32x128xbf16>, vector<32x128xf32> -> vector<32x128xf32>
    %c2_21 = arith.constant 2 : index
    %c0_22 = arith.constant 0 : index
    %c0_23 = arith.constant 0 : index
    %28 = vector.load %arg5[%c2_21, %c0_22, %c0_23] : memref<4x32x1xf32, #tpu.memory_space<vmem>>, vector<1x32x1xf32>
    %29 = vector.shape_cast %28 : vector<1x32x1xf32> to vector<32x1xf32>
    %30 = vector.broadcast %29 : vector<32x1xf32> to vector<32x128xf32>
    %31 = arith.addf %27, %30 : vector<32x128xf32>
    %32 = math.tanh %31 : vector<32x128xf32>
    %c3 = arith.constant 3 : index
    %c0_24 = arith.constant 0 : index
    %c0_25 = arith.constant 0 : index
    %33 = vector.load %arg4[%c3, %c0_24, %c0_25] : memref<4x32x32xbf16, #tpu.memory_space<vmem>>, vector<1x32x32xbf16>
    %34 = vector.shape_cast %33 : vector<1x32x32xbf16> to vector<32x32xbf16>
    %35 = arith.truncf %32 : vector<32x128xf32> to vector<32x128xbf16>
    %cst_26 = arith.constant dense<0.000000e+00> : vector<32x128xf32>
    %36 = tpu.matmul %34, %35, %cst_26 {dimension_numbers = #tpu.dot_dimension_numbers<[1], [0], [0], [1], [0, 0, 1, 1], [], []>} : vector<32x32xbf16>, vector<32x128xbf16>, vector<32x128xf32> -> vector<32x128xf32>
    %c3_27 = arith.constant 3 : index
    %c0_28 = arith.constant 0 : index
    %c0_29 = arith.constant 0 : index
    %37 = vector.load %arg5[%c3_27, %c0_28, %c0_29] : memref<4x32x1xf32, #tpu.memory_space<vmem>>, vector<1x32x1xf32>
    %38 = vector.shape_cast %37 : vector<1x32x1xf32> to vector<32x1xf32>
    %39 = vector.broadcast %38 : vector<32x1xf32> to vector<32x128xf32>
    %40 = arith.addf %36, %39 : vector<32x128xf32>
    %41 = math.tanh %40 : vector<32x128xf32>
    %42 = arith.addf %14, %23 : vector<32x128xf32>
    %cst_30 = arith.constant 5.000000e-01 : f32
    %43 = vector.broadcast %cst_30 : f32 to vector<32x128xf32>
    %44 = arith.mulf %42, %43 : vector<32x128xf32>
    %45 = arith.truncf %44 : vector<32x128xf32> to vector<32x128xbf16>
    %46 = arith.addf %32, %41 : vector<32x128xf32>
    %cst_31 = arith.constant 5.000000e-01 : f32
    %47 = vector.broadcast %cst_31 : f32 to vector<32x128xf32>
    %48 = arith.mulf %46, %47 : vector<32x128xf32>
    %49 = arith.truncf %48 : vector<32x128xf32> to vector<32x128xbf16>
    %c0_32 = arith.constant 0 : index
    %c0_33 = arith.constant 0 : index
    %c0_34 = arith.constant 0 : index
    %50 = vector.load %arg6[%c0_32, %c0_33, %c0_34] : memref<2x8x32xbf16, #tpu.memory_space<vmem>>, vector<1x8x32xbf16>
    %51 = vector.shape_cast %50 : vector<1x8x32xbf16> to vector<8x32xbf16>
    %cst_35 = arith.constant dense<0.000000e+00> : vector<8x128xf32>
    %52 = tpu.matmul %51, %45, %cst_35 {dimension_numbers = #tpu.dot_dimension_numbers<[1], [0], [0], [1], [0, 0, 1, 1], [], []>} : vector<8x32xbf16>, vector<32x128xbf16>, vector<8x128xf32> -> vector<8x128xf32>
    %c1_36 = arith.constant 1 : index
    %c0_37 = arith.constant 0 : index
    %c0_38 = arith.constant 0 : index
    %53 = vector.load %arg6[%c1_36, %c0_37, %c0_38] : memref<2x8x32xbf16, #tpu.memory_space<vmem>>, vector<1x8x32xbf16>
    %54 = vector.shape_cast %53 : vector<1x8x32xbf16> to vector<8x32xbf16>
    %cst_39 = arith.constant dense<0.000000e+00> : vector<8x128xf32>
    %55 = tpu.matmul %54, %49, %cst_39 {dimension_numbers = #tpu.dot_dimension_numbers<[1], [0], [0], [1], [0, 0, 1, 1], [], []>} : vector<8x32xbf16>, vector<32x128xbf16>, vector<8x128xf32> -> vector<8x128xf32>
    %56 = arith.addf %52, %55 : vector<8x128xf32>
    %c0_40 = arith.constant 0 : index
    %c0_41 = arith.constant 0 : index
    %57 = vector.load %arg7[%c0_40, %c0_41] : memref<8x1xf32, #tpu.memory_space<vmem>>, vector<8x1xf32>
    %58 = vector.broadcast %57 : vector<8x1xf32> to vector<8x128xf32>
    %59 = arith.addf %56, %58 : vector<8x128xf32>
    %c0_42 = arith.constant 0 : index
    %c0_43 = arith.constant 0 : index
    %60 = vector.load %arg8[%c0_42, %c0_43] : memref<8x128xf32, #tpu.memory_space<vmem>>, vector<8x128xf32>
    tpu.vector_store %arg8[%c0_42, %c0_43], %59 {strides = array<i32>} : memref<8x128xf32, #tpu.memory_space<vmem>>, vector<8x128xf32>,
    return
  }
  func.func @transform_0(%arg0: i32) -> (i32, i32) {
    %c0_i32 = arith.constant 0 : i32
    %c0_i32_0 = arith.constant 0 : i32
    return %c0_i32, %arg0 : i32, i32
  }
  func.func @transform_1(%arg0: i32) -> (i32, i32) {
    %c0_i32 = arith.constant 0 : i32
    %c0_i32_0 = arith.constant 0 : i32
    %c0_i32_1 = arith.constant 0 : i32
    return %c0_i32, %c0_i32_0 : i32, i32
  }
  func.func @transform_2(%arg0: i32) -> (i32, i32) {
    %c0_i32 = arith.constant 0 : i32
    %c0_i32_0 = arith.constant 0 : i32
    %c0_i32_1 = arith.constant 0 : i32
    return %c0_i32, %c0_i32_0 : i32, i32
  }
  func.func @transform_3(%arg0: i32) -> (i32, i32, i32) {
    %c0_i32 = arith.constant 0 : i32
    %c0_i32_0 = arith.constant 0 : i32
    %c0_i32_1 = arith.constant 0 : i32
    %c0_i32_2 = arith.constant 0 : i32
    return %c0_i32, %c0_i32_0, %c0_i32_1 : i32, i32, i32
  }
  func.func @transform_4(%arg0: i32) -> (i32, i32, i32) {
    %c0_i32 = arith.constant 0 : i32
    %c0_i32_0 = arith.constant 0 : i32
    %c0_i32_1 = arith.constant 0 : i32
    %c0_i32_2 = arith.constant 0 : i32
    return %c0_i32, %c0_i32_0, %c0_i32_1 : i32, i32, i32
  }
  func.func @transform_5(%arg0: i32) -> (i32, i32, i32) {
    %c0_i32 = arith.constant 0 : i32
    %c0_i32_0 = arith.constant 0 : i32
    %c0_i32_1 = arith.constant 0 : i32
    %c0_i32_2 = arith.constant 0 : i32
    return %c0_i32, %c0_i32_0, %c0_i32_1 : i32, i32, i32
  }
  func.func @transform_6(%arg0: i32) -> (i32, i32) {
    %c0_i32 = arith.constant 0 : i32
    %c0_i32_0 = arith.constant 0 : i32
    %c0_i32_1 = arith.constant 0 : i32
    return %c0_i32, %c0_i32_0 : i32, i32
  }
  func.func @transform_7(%arg0: i32) -> (i32, i32) {
    %c0_i32 = arith.constant 0 : i32
    %c0_i32_0 = arith.constant 0 : i32
    return %c0_i32, %arg0 : i32, i32
  }
}

module attributes {stable_mosaic.version = 11 : i64} {
  func.func @_points_kernel(%arg0: i32, %arg1: i32, %arg2: memref<1x1x20x4xf32, #tpu.memory_space<vmem>>, %arg3: memref<4x128xbf16, #tpu.memory_space<vmem>>, %arg4: memref<80x20xbf16, #tpu.memory_space<vmem>>, %arg5: memref<1x3x16x128xf32, #tpu.memory_space<vmem>>, %arg6: memref<1x3x16x128xf32, #tpu.memory_space<vmem>>, %arg7: memref<1x1x16x128xf32, #tpu.memory_space<vmem>>, %arg8: memref<1x1x16x128xf32, #tpu.memory_space<vmem>>) attributes {dimension_semantics = [#tpu.dimension_semantics<parallel>, #tpu.dimension_semantics<parallel>], iteration_bounds = array<i64: 2, 1>, scalar_prefetch = 0 : i64, scratch_operands = 0 : i64, tpu.core_type = #tpu.core_type<tc>, window_params = [{transform_indices = @transform_0, window_bounds = array<i64: 1, 1, 20, 4>}, {pipeline_mode = #tpu.pipeline_mode<synchronous>, transform_indices = @transform_1, window_bounds = array<i64: 4, 128>}, {pipeline_mode = #tpu.pipeline_mode<synchronous>, transform_indices = @transform_2, window_bounds = array<i64: 80, 20>}, {transform_indices = @transform_3, window_bounds = array<i64: 1, 3, 16, 128>}, {transform_indices = @transform_4, window_bounds = array<i64: 1, 3, 16, 128>}, {transform_indices = @transform_5, window_bounds = array<i64: 1, 1, 16, 128>}, {transform_indices = @transform_6, window_bounds = array<i64: 1, 1, 16, 128>}]} {
    %c0 = arith.constant 0 : index
    %c0_0 = arith.constant 0 : index
    %c0_1 = arith.constant 0 : index
    %c0_2 = arith.constant 0 : index
    %0 = vector.load %arg2[%c0, %c0_0, %c0_1, %c0_2] : memref<1x1x20x4xf32, #tpu.memory_space<vmem>>, vector<1x1x20x4xf32>
    %1 = vector.shape_cast %0 : vector<1x1x20x4xf32> to vector<20x4xf32>
    %2 = arith.truncf %1 : vector<20x4xf32> to vector<20x4xbf16>
    %c0_3 = arith.constant 0 : index
    %c0_4 = arith.constant 0 : index
    %3 = vector.load %arg3[%c0_3, %c0_4] : memref<4x128xbf16, #tpu.memory_space<vmem>>, vector<4x128xbf16>
    %cst = arith.constant dense<0.000000e+00> : vector<20x128xf32>
    %4 = tpu.matmul %2, %3, %cst {dimension_numbers = #tpu.dot_dimension_numbers<[1], [0], [0], [1], [0, 0, 1, 1], [], []>} : vector<20x4xbf16>, vector<4x128xbf16>, vector<20x128xf32> -> vector<20x128xf32>
    %c0_5 = arith.constant 0 : index
    %c0_6 = arith.constant 0 : index
    %5 = vector.load %arg4[%c0_5, %c0_6] : memref<80x20xbf16, #tpu.memory_space<vmem>>, vector<80x20xbf16>
    %6 = arith.truncf %4 : vector<20x128xf32> to vector<20x128xbf16>
    %cst_7 = arith.constant dense<0.000000e+00> : vector<80x128xf32>
    %7 = tpu.matmul %5, %6, %cst_7 {dimension_numbers = #tpu.dot_dimension_numbers<[1], [0], [0], [1], [0, 0, 1, 1], [], []>} : vector<80x20xbf16>, vector<20x128xbf16>, vector<80x128xf32> -> vector<80x128xf32>
    %8 = vector.extract_strided_slice %7 {offsets = [0, 0], sizes = [16, 128], strides = [1, 1]} : vector<80x128xf32> to vector<16x128xf32>
    %9 = vector.extract_strided_slice %7 {offsets = [16, 0], sizes = [16, 128], strides = [1, 1]} : vector<80x128xf32> to vector<16x128xf32>
    %10 = vector.extract_strided_slice %7 {offsets = [32, 0], sizes = [16, 128], strides = [1, 1]} : vector<80x128xf32> to vector<16x128xf32>
    %11 = vector.extract_strided_slice %7 {offsets = [48, 0], sizes = [16, 128], strides = [1, 1]} : vector<80x128xf32> to vector<16x128xf32>
    %12 = vector.extract_strided_slice %7 {offsets = [64, 0], sizes = [16, 128], strides = [1, 1]} : vector<80x128xf32> to vector<16x128xf32>
    %cst_8 = arith.constant -8.000000e+01 : f32
    %cst_9 = arith.constant 8.000000e+01 : f32
    %13 = vector.broadcast %cst_8 : f32 to vector<16x128xf32>
    %14 = arith.maximumf %13, %11 : vector<16x128xf32>
    %15 = vector.broadcast %cst_9 : f32 to vector<16x128xf32>
    %16 = arith.minimumf %15, %14 : vector<16x128xf32>
    %17 = math.exp %16 : vector<16x128xf32>
    %cst_10 = arith.constant -1.500000e+01 : f32
    %cst_11 = arith.constant 1.500000e+01 : f32
    %18 = vector.broadcast %cst_10 : f32 to vector<16x128xf32>
    %19 = arith.maximumf %18, %12 : vector<16x128xf32>
    %20 = vector.broadcast %cst_11 : f32 to vector<16x128xf32>
    %21 = arith.minimumf %20, %19 : vector<16x128xf32>
    %cst_12 = arith.constant 5.000000e-01 : f32
    %22 = vector.broadcast %cst_12 : f32 to vector<16x128xf32>
    %23 = arith.mulf %22, %21 : vector<16x128xf32>
    %24 = math.tanh %23 : vector<16x128xf32>
    %cst_13 = arith.constant 1.000000e+00 : f32
    %25 = vector.broadcast %cst_13 : f32 to vector<16x128xf32>
    %26 = arith.addf %24, %25 : vector<16x128xf32>
    %cst_14 = arith.constant 5.000000e-01 : f32
    %27 = vector.broadcast %cst_14 : f32 to vector<16x128xf32>
    %28 = arith.mulf %27, %26 : vector<16x128xf32>
    %29 = arith.mulf %8, %17 : vector<16x128xf32>
    %c0_15 = arith.constant 0 : index
    %c0_16 = arith.constant 0 : index
    %c0_17 = arith.constant 0 : index
    %c0_18 = arith.constant 0 : index
    %30 = vector.load %arg5[%c0_15, %c0_16, %c0_17, %c0_18] : memref<1x3x16x128xf32, #tpu.memory_space<vmem>>, vector<1x1x16x128xf32>
    %31 = vector.shape_cast %30 : vector<1x1x16x128xf32> to vector<16x128xf32>
    %32 = vector.shape_cast %29 : vector<16x128xf32> to vector<1x1x16x128xf32>
    tpu.vector_store %arg5[%c0_15, %c0_16, %c0_17, %c0_18], %32 {strides = array<i32>} : memref<1x3x16x128xf32, #tpu.memory_space<vmem>>, vector<1x1x16x128xf32>,
    %33 = arith.mulf %9, %17 : vector<16x128xf32>
    %c0_19 = arith.constant 0 : index
    %c1 = arith.constant 1 : index
    %c0_20 = arith.constant 0 : index
    %c0_21 = arith.constant 0 : index
    %34 = vector.load %arg5[%c0_19, %c1, %c0_20, %c0_21] : memref<1x3x16x128xf32, #tpu.memory_space<vmem>>, vector<1x1x16x128xf32>
    %35 = vector.shape_cast %34 : vector<1x1x16x128xf32> to vector<16x128xf32>
    %36 = vector.shape_cast %33 : vector<16x128xf32> to vector<1x1x16x128xf32>
    tpu.vector_store %arg5[%c0_19, %c1, %c0_20, %c0_21], %36 {strides = array<i32>} : memref<1x3x16x128xf32, #tpu.memory_space<vmem>>, vector<1x1x16x128xf32>,
    %37 = arith.mulf %10, %17 : vector<16x128xf32>
    %c0_22 = arith.constant 0 : index
    %c2 = arith.constant 2 : index
    %c0_23 = arith.constant 0 : index
    %c0_24 = arith.constant 0 : index
    %38 = vector.load %arg5[%c0_22, %c2, %c0_23, %c0_24] : memref<1x3x16x128xf32, #tpu.memory_space<vmem>>, vector<1x1x16x128xf32>
    %39 = vector.shape_cast %38 : vector<1x1x16x128xf32> to vector<16x128xf32>
    %40 = vector.shape_cast %37 : vector<16x128xf32> to vector<1x1x16x128xf32>
    tpu.vector_store %arg5[%c0_22, %c2, %c0_23, %c0_24], %40 {strides = array<i32>} : memref<1x3x16x128xf32, #tpu.memory_space<vmem>>, vector<1x1x16x128xf32>,
    %41 = arith.mulf %8, %8 : vector<16x128xf32>
    %42 = arith.mulf %9, %9 : vector<16x128xf32>
    %43 = arith.addf %41, %42 : vector<16x128xf32>
    %44 = arith.mulf %10, %10 : vector<16x128xf32>
    %45 = arith.addf %43, %44 : vector<16x128xf32>
    %cst_25 = arith.constant 1.000000e-10 : f32
    %46 = vector.broadcast %cst_25 : f32 to vector<16x128xf32>
    %47 = arith.maximumf %45, %46 : vector<16x128xf32>
    %48 = math.rsqrt %47 : vector<16x128xf32>
    %49 = arith.mulf %8, %48 : vector<16x128xf32>
    %c0_26 = arith.constant 0 : index
    %c0_27 = arith.constant 0 : index
    %c0_28 = arith.constant 0 : index
    %c0_29 = arith.constant 0 : index
    %50 = vector.load %arg6[%c0_26, %c0_27, %c0_28, %c0_29] : memref<1x3x16x128xf32, #tpu.memory_space<vmem>>, vector<1x1x16x128xf32>
    %51 = vector.shape_cast %50 : vector<1x1x16x128xf32> to vector<16x128xf32>
    %52 = vector.shape_cast %49 : vector<16x128xf32> to vector<1x1x16x128xf32>
    tpu.vector_store %arg6[%c0_26, %c0_27, %c0_28, %c0_29], %52 {strides = array<i32>} : memref<1x3x16x128xf32, #tpu.memory_space<vmem>>, vector<1x1x16x128xf32>,
    %53 = arith.mulf %9, %48 : vector<16x128xf32>
    %c0_30 = arith.constant 0 : index
    %c1_31 = arith.constant 1 : index
    %c0_32 = arith.constant 0 : index
    %c0_33 = arith.constant 0 : index
    %54 = vector.load %arg6[%c0_30, %c1_31, %c0_32, %c0_33] : memref<1x3x16x128xf32, #tpu.memory_space<vmem>>, vector<1x1x16x128xf32>
    %55 = vector.shape_cast %54 : vector<1x1x16x128xf32> to vector<16x128xf32>
    %56 = vector.shape_cast %53 : vector<16x128xf32> to vector<1x1x16x128xf32>
    tpu.vector_store %arg6[%c0_30, %c1_31, %c0_32, %c0_33], %56 {strides = array<i32>} : memref<1x3x16x128xf32, #tpu.memory_space<vmem>>, vector<1x1x16x128xf32>,
    %57 = arith.mulf %10, %48 : vector<16x128xf32>
    %c0_34 = arith.constant 0 : index
    %c2_35 = arith.constant 2 : index
    %c0_36 = arith.constant 0 : index
    %c0_37 = arith.constant 0 : index
    %58 = vector.load %arg6[%c0_34, %c2_35, %c0_36, %c0_37] : memref<1x3x16x128xf32, #tpu.memory_space<vmem>>, vector<1x1x16x128xf32>
    %59 = vector.shape_cast %58 : vector<1x1x16x128xf32> to vector<16x128xf32>
    %60 = vector.shape_cast %57 : vector<16x128xf32> to vector<1x1x16x128xf32>
    tpu.vector_store %arg6[%c0_34, %c2_35, %c0_36, %c0_37], %60 {strides = array<i32>} : memref<1x3x16x128xf32, #tpu.memory_space<vmem>>, vector<1x1x16x128xf32>,
    %c0_38 = arith.constant 0 : index
    %c0_39 = arith.constant 0 : index
    %c0_40 = arith.constant 0 : index
    %c0_41 = arith.constant 0 : index
    %61 = vector.load %arg7[%c0_38, %c0_39, %c0_40, %c0_41] : memref<1x1x16x128xf32, #tpu.memory_space<vmem>>, vector<1x1x16x128xf32>
    %62 = vector.shape_cast %61 : vector<1x1x16x128xf32> to vector<16x128xf32>
    %63 = vector.shape_cast %28 : vector<16x128xf32> to vector<1x1x16x128xf32>
    tpu.vector_store %arg7[%c0_38, %c0_39, %c0_40, %c0_41], %63 {strides = array<i32>} : memref<1x1x16x128xf32, #tpu.memory_space<vmem>>, vector<1x1x16x128xf32>,
    %c0_42 = arith.constant 0 : index
    %c0_43 = arith.constant 0 : index
    %c0_44 = arith.constant 0 : index
    %c0_45 = arith.constant 0 : index
    %64 = vector.load %arg8[%c0_42, %c0_43, %c0_44, %c0_45] : memref<1x1x16x128xf32, #tpu.memory_space<vmem>>, vector<1x1x16x128xf32>
    %65 = vector.shape_cast %64 : vector<1x1x16x128xf32> to vector<16x128xf32>
    %66 = vector.shape_cast %17 : vector<16x128xf32> to vector<1x1x16x128xf32>
    tpu.vector_store %arg8[%c0_42, %c0_43, %c0_44, %c0_45], %66 {strides = array<i32>} : memref<1x1x16x128xf32, #tpu.memory_space<vmem>>, vector<1x1x16x128xf32>,
    return
  }
  func.func @transform_0(%arg0: i32, %arg1: i32) -> (i32, i32, i32, i32) {
    %c0_i32 = arith.constant 0 : i32
    %c0_i32_0 = arith.constant 0 : i32
    %c0_i32_1 = arith.constant 0 : i32
    return %arg0, %arg1, %c0_i32, %c0_i32_0 : i32, i32, i32, i32
  }
  func.func @transform_1(%arg0: i32, %arg1: i32) -> (i32, i32) {
    %c0_i32 = arith.constant 0 : i32
    %c0_i32_0 = arith.constant 0 : i32
    %c0_i32_1 = arith.constant 0 : i32
    return %c0_i32, %c0_i32_0 : i32, i32
  }
  func.func @transform_2(%arg0: i32, %arg1: i32) -> (i32, i32) {
    %c0_i32 = arith.constant 0 : i32
    %c0_i32_0 = arith.constant 0 : i32
    %c0_i32_1 = arith.constant 0 : i32
    return %c0_i32, %c0_i32_0 : i32, i32
  }
  func.func @transform_3(%arg0: i32, %arg1: i32) -> (i32, i32, i32, i32) {
    %c0_i32 = arith.constant 0 : i32
    %c0_i32_0 = arith.constant 0 : i32
    %c0_i32_1 = arith.constant 0 : i32
    return %arg0, %c0_i32, %arg1, %c0_i32_0 : i32, i32, i32, i32
  }
  func.func @transform_4(%arg0: i32, %arg1: i32) -> (i32, i32, i32, i32) {
    %c0_i32 = arith.constant 0 : i32
    %c0_i32_0 = arith.constant 0 : i32
    %c0_i32_1 = arith.constant 0 : i32
    return %arg0, %c0_i32, %arg1, %c0_i32_0 : i32, i32, i32, i32
  }
  func.func @transform_5(%arg0: i32, %arg1: i32) -> (i32, i32, i32, i32) {
    %c0_i32 = arith.constant 0 : i32
    %c0_i32_0 = arith.constant 0 : i32
    %c0_i32_1 = arith.constant 0 : i32
    return %arg0, %c0_i32, %arg1, %c0_i32_0 : i32, i32, i32, i32
  }
  func.func @transform_6(%arg0: i32, %arg1: i32) -> (i32, i32, i32, i32) {
    %c0_i32 = arith.constant 0 : i32
    %c0_i32_0 = arith.constant 0 : i32
    %c0_i32_1 = arith.constant 0 : i32
    return %arg0, %c0_i32, %arg1, %c0_i32_0 : i32, i32, i32, i32
  }
}

</mosaic_0001>

<bundles_post_ra>
// kernel: unidepthv2_forward.3
= control target key start
LH: loop header
LB: loop body
LE: loop exit
PB: predicated region body
PF: predicated region fallthrough
CT: control target
= control target key end

     0   :  { %s1486_s0 = inlined_call_operand.vmem [shape: f32[2,1,20,4], index: 0, kind: input, shape index: {}]   ;;  %s1487_s1 = inlined_call_operand.vmem [shape: bf16[4,128], index: 1, kind: input, shape index: {}]   ;;  %s1488_s2 = inlined_call_operand.vmem [shape: bf16[80,20], index: 2, kind: input, shape index: {}]   ;;  %s1489_s3 = inlined_call_operand.vmem [shape: f32[2,3,16,128], index: 3, kind: output, shape index: {0}]   ;;  %s1490_s4 = inlined_call_operand.hbm [shape: f32[2,3,16,128], index: 4, kind: output, shape index: {1}]   ;;  %s1491_s5 = inlined_call_operand.hbm [shape: f32[2,1,16,128], index: 5, kind: output, shape index: {2}]   ;;  %s1492_s6 = inlined_call_operand.hbm [shape: f32[2,1,16,128], index: 6, kind: output, shape index: {3}]  }
   0x1   :  { %1498 = sst [smem:[#allocation9_spill]] %s1486_s0 }
   0x2   :  { %1499 = sst [smem:[#allocation10_spill]] %s1487_s1 }
   0x3   :  { %12 = vsyncpa [#allocation3], 0 }
   0x4   :  { %14 = vsyncpa [#allocation3 + $0x1], 0 }
   0x5   :  { %15 = vsyncpa [#allocation5], 0 }
   0x6   :  { %17 = vsyncpa [#allocation5 + $0x1], 0  ;;  %s1209_s21 = smov 0   ;;  %s1211_s22 = smov 0  }
   0x7   :  { %s1213_s23 = smov 0   ;;  %s1215_s24 = smov 0  }
   0x8   :  { %s1217_s25 = smov 0   ;;  %s1219_s26 = smov 0  }
   0x9 LB: > { %s848_s27 = sadd.s32 4294967295, %s1165_s26   ;;  %s1493_s28 = sadd.s32 4294967294, %s1165_s26   ;;  %s1165_s26 = sphi %s1219_s26, %s23_s26   ;;  %s1161_s25 = sphi %s1217_s25, %s1515_s25   ;;  %s1157_s24 = sphi %s1215_s24, %s1514_s24   ;;  %s1153_s23 = sphi %s1213_s23, %s1513_s23   ;;  %s1149_s22 = sphi %s1211_s22, %s1512_s22   ;;  %s1145_s21 = sphi %s1209_s21, %s1511_s21  }
   0xa   : > { %s35_s29 = sadd.s32 1, %s1161_s25  ;;  %s142_s30 = sadd.s32 1, %s1153_s23 }
   0xb   : > { %p37_p0 = scmp.ge.s32.totalorder %s35_s29, 2  ;;  %p152_p1 = scmp.ne.s32.totalorder %s1153_s23, %s1149_s22 }
   0xc   : > { %p153_p2 = scmp.eq.s32.totalorder %s848_s27, 1  ;;  %p158_p3 = scmp.ne.s32.totalorder %s1149_s22, %s1145_s21 }
   0xd   : > { %s1517_s29 = smov (%p37_p0, %s35_s29), 0  ;;  %p159_p5 = scmp.eq.s32.totalorder %s1493_s28, 1 }
   0xe   : > { %p1251_p4 = por %p153_p2, %p152_p1  ;;  %s137_s8 = ssub.s32 %s1161_s25, %s1517_s29 }
   0xf   : > { %p852_p6 = scmp.ge.s32.totalorder %s1165_s26, 1  ;;  %p140_p7 = scmp.eq.s32.totalorder %s137_s8, 0 }
  0x10   : > { %p1260_p8 = por %p159_p5, %p158_p3  ;;  %p251_p9 = scmp.lt.s32.totalorder %s1165_s26, 3 }
  0x11   : > { %s1266_s10 = scalar_select %p140_p7, %s1153_s23, %s142_s30  }
  0x12   : > { %p252_p10 = pnand %p852_p6, %p251_p9 }
  0x13   : > { %s1502_s1 = sld [smem:[#allocation10_spill]] (!%p252_p10)  ;;  %vm340_vm0 = vcmask (!%p252_p10), 1041408   ;;  %p304_p11 = scmp.lt.s32.totalorder (!%p252_p10), %s1157_s24, 1  ;;  %vm333_vm1 = vcmask (!%p252_p10), 31744   ;;  %v1167_v7 = vmov (!%p252_p10), 0.0   ;;  %vm1168_vm2 = vmmov (!%p252_p10), 0  }
  0x14   : > { %255 = sbr.rel (%p252_p10) target bundleno = 568 (0x238), region = 32  ;;  %s1503_s0 = sld [smem:[#allocation9_spill]] (!%p252_p10)  ;;  %932 = vmatprep.subr.bf16.mxu1 (!%p252_p10), %v1167_v7  ;;  %920 = vmatprep.mubr.msk.bf16.mxu1 (!%p252_p10), %vm1168_vm2, %v1167_v7  ;;  %v1010_v15 = vld [vmem:[%s1488_s2] sm:$0xff] (!%p252_p10)   ;;  %v1011_v16 = vld [vmem:[%s1488_s2 + $0x10] sm:$0xff] (!%p252_p10)   ;;  %vm429_vm3 = vcmask (!%p252_p10), 162816   ;;  %v1012_v17 = vld [vmem:[%s1488_s2 + $0x8] sm:$0xff] (!%p252_p10)  }
  0x15   : > { %v1013_v18 = vld [vmem:[%s1488_s2 + $0x18] sm:$0xff] (!%p252_p10)   ;;  %v1014_v19 = vld [vmem:[%s1488_s2 + $0x20] sm:$0xff] (!%p252_p10)   ;;  %s940_s12 = smul.u32 (!%p252_p10), 768, %s1157_s24 }
  0x19   : > { %v332_v0 = vld [vmem:[%s1502_s1] sm:$0x3] (!%p252_p10) }
  0x1a   : > { %936 = vmatprep.subr.msk.bf16.mxu0 (!%p252_p10), %vm340_vm0, %v332_v0  ;;  %v342_v1 = vsel (!%p252_p10), %vm340_vm0, %v332_v0, 0 }
  0x1b   : > { %903 = vmatpush3.bf16.msra.mxu0 %v342_v1  ;;  %s1275_s13 = scalar_select %p304_p11, %s1157_s24, 1 }
  0x1c   : > { %908 = vmatprep.subr.bf16.mxu0 %v1167_v7 }
  0x1d   : > { %s938_s14 = smul.u32 24, %s1275_s13 }
  0x1e   : > { %s939_s19 = smul.u32 48, %s1275_s13 }
  0x1f   : > { %s312_s17 = scalar_lea.vmem %s1503_s0, %s938_s14 }
  0x20   : > { %v327_v2 = vld [vmem:[%s312_s17] sm:$0xff]  ;;  %v328_v3 = vld [vmem:[%s312_s17 + $0x8] sm:$0xff]  ;;  %v329_v4 = vld [vmem:[%s312_s17 + $0x10] sm:$0xf]  ;;  %s1319_s17 = sand.u32 1, %s1149_s22   ;;  %s321_s11 = scalar_lea.vmem %s1489_s3, %s939_s19 }
  0x21   : > { %v330_v5 = vpack.c.bf16 %v328_v3, %v327_v2  ;;  %v331_v6 = vpack.c.bf16 %v329_v4, %v329_v4  ;;  %s853_s18 = sshll.u32 %s1319_s17, 4  ;;  %s937_s20 = smul.u32 48, %s1319_s17 }
  0x22   : > { %s1331_s13 = scalar_lea.vmem [#allocation6], %s853_s18  ;;  %s1351_s30 = scalar_lea.vmem [#allocation4], %s853_s18 }
  0x23   : > { %904 = vmatprep.mubr.msk.bf16.mxu0 %vm333_vm1, %v330_v5  ;;  %s289_s14 = scalar_lea.vmem [#allocation2], %s937_s20  ;;  %s1345_s20 = scalar_lea.hbm %s1490_s4, %s940_s12 }
  0x24   : > { %905 = vmatmul.mubr.msk.bf16.vlgmr.msra.gmra.mrb[0].mxu0 %vm333_vm1, %v331_v6  ;;  %s626_s15 = sshll.u32 %s289_s14, 4  ;;  %s1169_s18 = smov [#allocation2]   ;;  %s1347_s15 = int_to_ptr.vmem [resolvable:$true] %s626_s15 }
  0x25   : > { %912 = vmatprep.mubr.msk.bf16.mxu0 %vm1168_vm2, %v1167_v7  ;;  %s1027_s19 = scalar_lea.vmem %s1347_s15, 768  ;;  %s1031_s28 = sshll.u32 %s1169_s18, 4  ;;  %s1032_s28 = int_to_ptr.vmem [resolvable:$false] %s1031_s28 }
  0x26   : > { %p1028_p12 = scmp.ne.s32.totalorder %s1347_s15, %s1027_s19  ;;  %s1033_s8 = scalar_lea.vmem %s1032_s28, 1536 }
  0x27   : > { %p1034_p1 = scmp.lt.s32.totalorder %s1347_s15, %s1032_s28  ;;  %p1035_p2 = scmp.lt.s32.totalorder %s1033_s8, %s1027_s19 }
  0x28   : > { %p1029_p13 = pnand %p1028_p12, %p1251_p4 }
  0x29   : > { %p1036_p3 = por %p1035_p2, %p1034_p1 }
  0x2a   : > { %p1030_p0 = pneg %p1029_p13 }
  0x2c   : > { %p1037_p5 = pnand %p1036_p3, %p1030_p0 }
  0xf7   : > { %v906_v8 = vpop.f32.mrb[0].mxu0 }
  0xf8   : > { %v378_v9 = vpop.f32.mrb[1].mxu0  ;;  %v403_v13 = vpack.c.bf16 %v906_v8, %v906_v8 }
  0xf9   : > { %v907_v10 = vpop.f32.mrb[2].mxu0 }
  0xfa   : > { %v381_v11 = vpop.f32.mrb[3].mxu0  ;;  %v446_v14 = vsel %vm340_vm0, %v403_v13, 0 }
  0xfb   : > { %v402_v12 = vpack.c.bf16 %v381_v11, %v378_v9 }
  0xfd   : > { %909 = vmatpush3.bf16.msra.mxu0 %v402_v12  ;;  %934 = vmatpush3.bf16.msra.mxu1 %v402_v12 }
  0xfe   : > { %910 = vmatprep.subr.bf16.mxu0 %v1167_v7  ;;  %933 = vmatprep.subr.bf16.mxu1 %v1167_v7 }
 0x101   : > { %911 = vmatpush3.bf16.msra.mxu0 %v446_v14  ;;  %935 = vmatpush3.bf16.msra.mxu1 %v446_v14 }
 0x104   : > { %913 = vmatmul.mubr.msk.bf16.vlgmr.msra.gmra.mrb[4].mxu0 %vm429_vm3, %v1010_v15  ;;  %921 = vmatmul.mubr.msk.bf16.vlgmr.msra.gmra.mrb[0].mxu1 %vm429_vm3, %v1011_v16 }
 0x105   : > { %916 = vmatprep.mubr.msk.bf16.mxu0 %vm1168_vm2, %v1167_v7  ;;  %924 = vmatprep.mubr.msk.bf16.mxu1 %vm1168_vm2, %v1167_v7 }
 0x10c   : > { %917 = vmatmul.mubr.msk.bf16.gmra.mrb[8].mxu0 %vm429_vm3, %v1012_v17  ;;  %925 = vmatmul.mubr.msk.bf16.gmra.mrb[4].mxu1 %vm429_vm3, %v1013_v18 }
 0x10d   : > { %928 = vmatprep.mubr.msk.bf16.mxu1 %vm1168_vm2, %v1167_v7 }
 0x114   : > { %929 = vmatmul.mubr.msk.bf16.gmra.mrb[8].mxu1 %vm429_vm3, %v1014_v19 }
 0x1d7   : > { %v1302_v20 = vpop.f32.mrb[0].mxu1  ;;  %v1304_v21 = vpop.f32.mrb[4].mxu0 }
 0x1d8   : > { %v922_v22 = vpop.f32.mrb[1].mxu1  ;;  %v914_v23 = vpop.f32.mrb[5].mxu0  ;;  %v555_v28 = vmul.f32 %v1304_v21, %v1304_v21  ;;  %v561_v35 = vmul.f32 %v1302_v20, %v1302_v20 }
 0x1d9   : > { %v1306_v24 = vpop.f32.mrb[2].mxu1  ;;  %v1308_v25 = vpop.f32.mrb[6].mxu0 }
 0x1da   : > { %v923_v26 = vpop.f32.mrb[3].mxu1  ;;  %v915_v27 = vpop.f32.mrb[7].mxu0  ;;  %v556_v36 = vmul.f32 %v1308_v25, %v1308_v25  ;;  %v562_v45 = vmul.f32 %v1306_v24, %v1306_v24 }
 0x1df   : > { %v490_v29 = vpop.f32.mrb[8].mxu0  ;;  %v506_v30 = vpop.f32.mrb[4].mxu1 }
 0x1e0   : > { %v557_v31 = vmul.f32 %v490_v29, %v490_v29  ;;  %v869_v32 = vclamps-f32 %v506_v30, 80.0  ;;  %v918_v33 = vpop.f32.mrb[9].mxu0  ;;  %v926_v34 = vpop.f32.mrb[5].mxu1 }
 0x1e1   : > { %v493_v37 = vpop.f32.mrb[10].mxu0  ;;  %v509_v38 = vpop.f32.mrb[6].mxu1 }
 0x1e2   : > { %v559_v39 = vadd.f32 %v557_v31, %v555_v28  ;;  %v525_v40 = vmul.f32 1.442695, %v869_v32  ;;  %v558_v41 = vmul.f32 %v493_v37, %v493_v37  ;;  %v870_v42 = vclamps-f32 %v509_v38, 80.0  ;;  %v927_v43 = vpop.f32.mrb[7].mxu1  ;;  %v919_v44 = vpop.f32.mrb[11].mxu0 }
 0x1e4   : > { %v563_v46 = vadd.f32 %v561_v35, %v559_v39  ;;  %1015 = vpow2.f32 %v525_v40  ;;  %v560_v47 = vadd.f32 %v558_v41, %v556_v36  ;;  %v527_v48 = vmul.f32 1.442695, %v870_v42 }
 0x1e6   : > { %v565_v49 = vmax.f32 %v563_v46, 1e-10  ;;  %v564_v50 = vadd.f32 %v562_v45, %v560_v47  ;;  %1017 = vpow2.f32 %v527_v48 }
 0x1e7   : > { %v514_v51 = vpop.f32.mrb[8].mxu1 }
 0x1e8   : > { %1019 = vrsqrt.f32 %v565_v49  ;;  %v566_v52 = vmax.f32 %v564_v50, 1e-10  ;;  %v871_v53 = vclamps-f32 %v514_v51, 15.0  ;;  %v930_v54 = vpop.f32.mrb[9].mxu1 }
 0x1e9   : > { %v517_v55 = vpop.f32.mrb[10].mxu1 }
 0x1ea   : > { %1021 = vrsqrt.f32 %v566_v52  ;;  %v533_v56 = vmul.f32 0.5, %v871_v53  ;;  %v872_v57 = vclamps-f32 %v517_v55, 15.0  ;;  %v931_v58 = vpop.f32.mrb[11].mxu1 }
 0x1ec   : > { %1023 = vtanh.f32 %v533_v56  ;;  %v534_v59 = vmul.f32 0.5, %v872_v57 }
 0x1ee   : > { %v1016_v60 = vpop.eup %1015  ;;  %1025 = vtanh.f32 %v534_v59 }
 0x1ef   : > { %v541_v61 = vmul.f32 %v1016_v60, %v1304_v21  ;;  %v545_v62 = vmul.f32 %v1016_v60, %v490_v29  ;;  %v550_v63 = vmul.f32 %v1016_v60, %v1302_v20  ;;  %585 = vst [vmem:[%s1331_s13] sm:$0xff] %v1016_v60 }
 0x1f0   : > { %v1018_v0 = vpop.eup %1017 }
 0x1f1   : > { %543 = vst [vmem:[%s321_s11] sm:$0xff] %v541_v61  ;;  %873 = vst [vmem:[%s321_s11 + $0x10] sm:$0xff] %v545_v62  ;;  %v542_v1 = vmul.f32 %v1018_v0, %v1308_v25  ;;  %v546_v2 = vmul.f32 %v1018_v0, %v493_v37  ;;  %v551_v3 = vmul.f32 %v1018_v0, %v1306_v24 }
 0x1f2   : > { %875 = vst [vmem:[%s321_s11 + $0x20] sm:$0xff] %v550_v63  ;;  %586 = vst [vmem:[%s1331_s13 + $0x8] sm:$0xff] %v1018_v0  ;;  %v1020_v4 = vpop.eup %1019 }
 0x1f3   : > { %v573_v5 = vmul.f32 %v1020_v4, %v490_v29  ;;  %544 = vst [vmem:[%s321_s11 + $0x8] sm:$0xff] %v542_v1  ;;  %874 = vst [vmem:[%s321_s11 + $0x18] sm:$0xff] %v546_v2  ;;  %v569_v6 = vmul.f32 %v1020_v4, %v1304_v21  ;;  %v578_v7 = vmul.f32 %v1020_v4, %v1302_v20 }
 0x1f4   : > { %876 = vst [vmem:[%s321_s11 + $0x28] sm:$0xff] %v551_v3  ;;  %v1022_v8 = vpop.eup %1021  ;;  %s1356_s11 = sand.u32 1, %s848_s27  }
 0x1f5   : > { %877 = vst [vmem:[%s289_s14 + $0x10] sm:$0xff] %v573_v5  ;;  %v574_v9 = vmul.f32 %v1022_v8, %v493_v37  ;;  %v570_v10 = vmul.f32 %v1022_v8, %v1308_v25  ;;  %571 = vst [vmem:[%s289_s14] sm:$0xff] %v569_v6  ;;  %v579_v11 = vmul.f32 %v1022_v8, %v1306_v24 }
 0x1f6   : > { %879 = vst [vmem:[%s289_s14 + $0x20] sm:$0xff] %v578_v7  ;;  %v1024_v12 = vpop.eup %1023 }
 0x1f7   : > { %878 = vst [vmem:[%s289_s14 + $0x18] sm:$0xff] %v574_v9  ;;  %v537_v13 = vadd.f32 1.0, %v1024_v12  ;;  %572 = vst [vmem:[%s289_s14 + $0x8] sm:$0xff] %v570_v10 }
 0x1f8   : > { %880 = vst [vmem:[%s289_s14 + $0x28] sm:$0xff] %v579_v11  ;;  %v1026_v14 = vpop.eup %1025 }
 0x1f9   : > { %1040 = shalt.err (!%p1037_p5)
}
 0x1fa   : > { %s1041_s27 = scalar_lea.hbm %s1345_s20, 768  ;;  %s1045_s18 = scalar_lea.hbm %s1490_s4, 1536 }
 0x1fb   : > { %p1042_p6 = scmp.ne.s32.totalorder %s1345_s20, %s1041_s27  ;;  %p1046_p10 = scmp.lt.u32.totalorder %s1345_s20, %s1490_s4 }
 0x1fc   : > { %p1047_p11 = scmp.lt.u32.totalorder %s1045_s18, %s1041_s27  ;;  %p1049_p13 = scmp.lt.u32.totalorder %s1041_s27, %s1345_s20 }
 0x1fd   : > { %p1043_p7 = pnand %p1042_p6, %p1251_p4 }
 0x1fe   : > { %p1048_p12 = por %p1047_p11, %p1046_p10 }
 0x1ff   : > { %p1044_p9 = pneg %p1043_p7 }
 0x200   : > { %p1050_p0 = por %p1049_p13, %p1048_p12 }
 0x202   : > { %p1051_p1 = pnand %p1050_p0, %p1044_p9 }
 0x204   : > { %1054 = shalt.err (!%p1051_p1)
}
 0x205   : > { %s1494_s8 = smov 128   ;;  %s1496_s16 = smov 8   ;;  %v539_v15 = vmul.f32 0.5, %v537_v13  ;;  %v538_v16 = vadd.f32 1.0, %v1026_v14 }
 0x206   : > { %s1504_s12 = scalar_lea.sflag [#allocation3], %s1319_s17  ;;  %s662_s19 = sshll.u32 %s1331_s13, 4  ;;  %s1399_s19 = int_to_ptr.vmem [resolvable:$true] %s662_s19 }
 0x207   : > { %941 = dma.vmem_to_hbm [thread:$0]  (%p1251_p4), %s1347_s15, 768, %s1345_s20, %s1504_s12, %s1494_s8, %s1494_s8, %s1496_s16   ;;  %v540_v17 = vmul.f32 0.5, %v538_v16 }
 0x208   : > { %s1505_s27 = sshll.u32 %s1351_s30, 4  ;;  %583 = vst [vmem:[%s1351_s30] sm:$0xff] %v539_v15  ;;  %s1506_s14 = sshll.u32 %s1157_s24, 8  ;;  %s1389_s27 = int_to_ptr.vmem [resolvable:$true] %s1505_s27 }
 0x209   : > { %s1397_s0 = scalar_lea.hbm %s1491_s5, %s1506_s14  ;;  %s1507_s17 = smov %s1506_s14  ;;  %584 = vst [vmem:[%s1351_s30 + $0x8] sm:$0xff] %v540_v17 }
 0x20a   : > { %s1406_s20 = scalar_lea.hbm %s1492_s6, %s1507_s17  ;;  %s602_s12 = scalar_lea.sflag [#allocation5], %s1356_s11 }
 0x20b   : > { %s1055_s8 = scalar_lea.vmem %s1389_s27, 256  ;;  %s1172_s16 = smov [#allocation4]  }
 0x20c   : > { %p1056_p2 = scmp.ne.s32.totalorder %s1389_s27, %s1055_s8  ;;  %s1059_s1 = sshll.u32 %s1172_s16, 4  ;;  %s1060_s1 = int_to_ptr.vmem [resolvable:$false] %s1059_s1 }
 0x20d   : > { %s1061_s14 = scalar_lea.vmem %s1060_s1, 512  ;;  %p1062_p6 = scmp.lt.s32.totalorder %s1389_s27, %s1060_s1 }
 0x20e   : > { %p1057_p3 = pnand %p1056_p2, %p1251_p4  ;;  %p1063_p7 = scmp.lt.s32.totalorder %s1061_s14, %s1055_s8 }
 0x210   : > { %p1058_p5 = pneg %p1057_p3  ;;  %p1064_p9 = por %p1063_p7, %p1062_p6 }
 0x212   : > { %p1065_p10 = pnand %p1064_p9, %p1058_p5 }
 0x214   : > { %1068 = shalt.err (!%p1065_p10)
}
 0x215   : > { %s1069_s24 = scalar_lea.hbm %s1397_s0, 256  ;;  %s1073_s16 = scalar_lea.hbm %s1491_s5, 512 }
 0x216   : > { %p1070_p11 = scmp.ne.s32.totalorder %s1397_s0, %s1069_s24  ;;  %p1074_p0 = scmp.lt.u32.totalorder %s1397_s0, %s1491_s5 }
 0x217   : > { %p1075_p1 = scmp.lt.u32.totalorder %s1073_s16, %s1069_s24  ;;  %p1077_p3 = scmp.lt.u32.totalorder %s1069_s24, %s1397_s0 }
 0x218   : > { %p1071_p12 = pnand %p1070_p11, %p1251_p4 }
 0x219   : > { %p1076_p2 = por %p1075_p1, %p1074_p0 }
 0x21a   : > { %p1072_p13 = pneg %p1071_p12 }
 0x21b   : > { %p1078_p5 = por %p1077_p3, %p1076_p2 }
 0x21d   : > { %p1079_p6 = pnand %p1078_p5, %p1072_p13 }
 0x21f   : > { %1082 = shalt.err (!%p1079_p6)
}
 0x220   : > { %s1508_s8 = smov 8   ;;  %s1509_s17 = smov 128  }
 0x221   : > { %942 = dma.vmem_to_hbm [thread:$0]  (%p1251_p4), %s1389_s27, 256, %s1397_s0, %s602_s12, %s1509_s17, %s1509_s17, %s1508_s8  }
 0x222   : > { %s1083_s15 = scalar_lea.vmem %s1399_s19, 256  ;;  %s1173_s13 = smov [#allocation6]  }
 0x223   : > { %p1084_p7 = scmp.ne.s32.totalorder %s1399_s19, %s1083_s15  ;;  %s1087_s14 = sshll.u32 %s1173_s13, 4  ;;  %s1088_s14 = int_to_ptr.vmem [resolvable:$false] %s1087_s14 }
 0x224   : > { %s1089_s24 = scalar_lea.vmem %s1088_s14, 512  ;;  %p1090_p11 = scmp.lt.s32.totalorder %s1399_s19, %s1088_s14 }
 0x225   : > { %p1085_p9 = pnand %p1084_p7, %p1251_p4  ;;  %p1091_p12 = scmp.lt.s32.totalorder %s1089_s24, %s1083_s15 }
 0x227   : > { %p1086_p10 = pneg %p1085_p9  ;;  %p1092_p13 = por %p1091_p12, %p1090_p11 }
 0x229   : > { %p1093_p0 = pnand %p1092_p13, %p1086_p10 }
 0x22b   : > { %1096 = shalt.err (!%p1093_p0)
}
 0x22c   : > { %s1097_s0 = scalar_lea.hbm %s1406_s20, 256  ;;  %s1101_s18 = scalar_lea.hbm %s1492_s6, 512 }
 0x22d   : > { %p1098_p1 = scmp.ne.s32.totalorder %s1406_s20, %s1097_s0  ;;  %p1102_p5 = scmp.lt.u32.totalorder %s1406_s20, %s1492_s6 }
 0x22e   : > { %p1103_p6 = scmp.lt.u32.totalorder %s1101_s18, %s1097_s0  ;;  %p1105_p9 = scmp.lt.u32.totalorder %s1097_s0, %s1406_s20 }
 0x22f   : > { %p1099_p2 = pnand %p1098_p1, %p1251_p4 }
 0x230   : > { %p1104_p7 = por %p1103_p6, %p1102_p5 }
 0x231   : > { %p1100_p3 = pneg %p1099_p2 }
 0x232   : > { %p1106_p10 = por %p1105_p9, %p1104_p7 }
 0x234   : > { %p1107_p11 = pnand %p1106_p10, %p1100_p3 }
 0x236   : > { %1110 = shalt.err (!%p1107_p11)
}
 0x237   : > { %943 = dma.vmem_to_hbm [thread:$0]  (%p1251_p4), %s1399_s19, 256, %s1406_s20, %s602_s12, %s1509_s17, %s1509_s17, %s1508_s8  }
 0x238 PF: > { %p957_p12 = scmp.ge.s32.totalorder %s1165_s26, 2  ;;  %s689_s1 = sand.u32 1, %s1145_s21  }
 0x239   : > { %s690_s15 = scalar_lea.sflag [#allocation3], %s689_s1 }
 0x23a   : > { %p948_p13 = pnand %p957_p12, %p1260_p8 }
 0x23c   : > { %1136 = dma.done.wait (!%p948_p13), %s690_s15, 768  }
 0x23d   : > { %1138 = vsyncadd (!%p948_p13), %s690_s15, 4294966528  ;;  %s1510_s7 = sadd.s32 4294967294, %s1165_s26  }
 0x23e   : > { %s698_s13 = sand.u32 1, %s1510_s7  }
 0x23f   : > { %s699_s14 = scalar_lea.sflag [#allocation5], %s698_s13 }
 0x240   : > { %1140 = dma.done.wait (!%p948_p13), %s699_s14, 512  }
 0x241   : > { %1142 = vsyncadd (!%p948_p13), %s699_s14, 4294966784  ;;  %s23_s26 = sadd.s32 1, %s1165_s26   ;;  %s1511_s21 = smov %s1149_s22 }
 0x242   : > { %p20_p4 = scmp.ge.s32.totalorder %s23_s26, 4   ;;  %s1512_s22 = smov %s1153_s23 }
 0x243   : > { %s1513_s23 = smov %s1266_s10  ;;  %s1514_s24 = smov %s1161_s25 }
 0x244   : > { %s1515_s25 = smov %s1517_s29  ;;  %22 = sbr.rel (!%p20_p4) target bundleno = 9 (0x9), region = 115 }
 0x24b   :  { %713 = vsyncpa [#allocation3], 1 }
 0x24c   :  { %715 = vsyncpa [#allocation3 + $0x1], 1 }
 0x24d   :  { %716 = vsyncpa [#allocation5], 1 }
 0x24e   :  { %718 = vsyncpa [#allocation5 + $0x1], 1 }

// kernel: unidepthv2_forward.2
= control target key start
LH: loop header
LB: loop body
LE: loop exit
PB: predicated region body
PF: predicated region fallthrough
CT: control target
= control target key end

     0   :  { %v854_v1 = vmov 0   ;;  %vm89_vm0 = vcmask 392192   ;;  %vm185_vm1 = vcmask 261120   ;;  %vm856_vm2 = vmmov 0   ;;  %s1026_s0 = inlined_call_operand.vmem [shape: bf16[48,128], index: 0, kind: input, shape index: {}]   ;;  %s1027_s1 = inlined_call_operand.vmem [shape: bf16[32,48], index: 1, kind: input, shape index: {}]   ;;  %s1028_s2 = inlined_call_operand.vmem [shape: f32[32,1], index: 2, kind: input, shape index: {}]   ;;  %s1029_s4 = inlined_call_operand.vmem [shape: f32[4,32,1], index: 4, kind: input, shape index: {}]   ;;  %s1030_s6 = inlined_call_operand.vmem [shape: f32[8,1], index: 6, kind: input, shape index: {}]   ;;  %s1031_s3 = inlined_call_operand.vmem [shape: bf16[4,32,32], index: 3, kind: input, shape index: {}]   ;;  %s1032_s5 = inlined_call_operand.vmem [shape: bf16[2,8,32], index: 5, kind: input, shape index: {}]   ;;  %s1033_s7 = inlined_call_operand.vmem [shape: f32[8,128], index: 7, kind: output, shape index: {}]  }
   0x1   :  { %v809_v0 = vld [vmem:[%s1026_s0] sm:$0xff]   ;;  %807 = vset.pattern.permute.xlu0 %v854_v1  ;;  %808 = vset.pattern.permute.xlu1 %v854_v1  ;;  %v810_v2 = vld [vmem:[%s1026_s0 + $0x8] sm:$0xff]   ;;  %v811_v4 = vld [vmem:[%s1026_s0 + $0x10] sm:$0xff]  }
   0x2   :  { %746 = vmatprep.subr.bf16.mxu0 %v809_v0  ;;  %v812_v3 = vld [vmem:[%s1027_s1] sm:$0xff]   ;;  %v39_v6 = vld [vmem:[%s1028_s2 + $0x10] sm:$0xff]  ;;  %v38_v7 = vld [vmem:[%s1028_s2 + $0x8] sm:$0xff] }
   0x3   :  { %747 = vmatpush3.bf16.msra.mxu0 %v809_v0  ;;  %752 = vmatprep.mubr.msk.bf16.mxu0 %vm89_vm0, %v812_v3  ;;  %v37_v5 = vld [vmem:[%s1028_s2] sm:$0xff]  ;;  %v40_v8 = vld [vmem:[%s1028_s2 + $0x18] sm:$0xff]  ;;  %v813_v9 = vld [vmem:[%s1027_s1 + $0x8] sm:$0xff]  }
   0x4   :  { %748 = vmatprep.subr.bf16.mxu0 %v810_v2  ;;  %43 = vperm.xlu0 %807, %v37_v5   ;;  %v151_v10 = vld [vmem:[%s1029_s4] sm:$0xff]  ;;  %v152_v11 = vld [vmem:[%s1029_s4 + $0x8] sm:$0xff]  ;;  %v153_v12 = vld [vmem:[%s1029_s4 + $0x10] sm:$0xff] }
   0x5   :  { %53 = vperm.xlu1 %808, %v39_v6   ;;  %v154_v13 = vld [vmem:[%s1029_s4 + $0x18] sm:$0xff]  ;;  %v684_v14 = vld [vmem:[%s1029_s4 + $0x20] sm:$0xff]  ;;  %v685_v15 = vld [vmem:[%s1029_s4 + $0x28] sm:$0xff] }
   0x6   :  { %v686_v16 = vld [vmem:[%s1029_s4 + $0x30] sm:$0xff]  ;;  %v687_v17 = vld [vmem:[%s1029_s4 + $0x38] sm:$0xff]  ;;  %v696_v18 = vld [vmem:[%s1029_s4 + $0x40] sm:$0xff] }
   0x7   :  { %749 = vmatpush3.bf16.msra.mxu0 %v810_v2  ;;  %v697_v19 = vld [vmem:[%s1029_s4 + $0x48] sm:$0xff]  ;;  %v698_v20 = vld [vmem:[%s1029_s4 + $0x50] sm:$0xff]  ;;  %v699_v21 = vld [vmem:[%s1029_s4 + $0x58] sm:$0xff] }
   0x8   :  { %750 = vmatprep.subr.bf16.mxu0 %v811_v4  ;;  %48 = vperm.xlu0 %807, %v38_v7   ;;  %v708_v22 = vld [vmem:[%s1029_s4 + $0x60] sm:$0xff]  ;;  %v709_v23 = vld [vmem:[%s1029_s4 + $0x68] sm:$0xff]  ;;  %v710_v24 = vld [vmem:[%s1029_s4 + $0x70] sm:$0xff] }
   0x9   :  { %58 = vperm.xlu1 %808, %v40_v8   ;;  %v711_v25 = vld [vmem:[%s1029_s4 + $0x78] sm:$0xff]  ;;  %v657_v26 = vld [vmem:[%s1030_s6] sm:$0xff]  ;;  %v815_v42 = vld [vmem:[%s1031_s3 + $0x8] sm:$0xff]  }
   0xa   :  { %v814_v27 = vld [vmem:[%s1031_s3] sm:$0xff]   ;;  %v816_v43 = vld [vmem:[%s1031_s3 + $0x10] sm:$0xff]   ;;  %v817_v62 = vld [vmem:[%s1031_s3 + $0x18] sm:$0xff]  }
   0xb   :  { %751 = vmatpush3.bf16.msra.mxu0 %v811_v4  ;;  %760 = vmatprep.mubr.msk.bf16.mxu1 %vm185_vm1, %v814_v27  ;;  %v818_v63 = vld [vmem:[%s1031_s3 + $0x20] sm:$0xff]  }
   0xc   :  { %157 = vperm.xlu0 %807, %v151_v10  }
   0xd   :  { %162 = vperm.xlu1 %808, %v152_v11  }
   0xe   :  { %753 = vmatmul.mubr.msk.bf16.vlgmr.msra.gmra.mrb[0].mxu0 %vm89_vm0, %v813_v9 }
   0xf   :  { %776 = vmatprep.mubr.msk.bf16.mxu0 %vm185_vm1, %v818_v63 }
  0x10   :  { %167 = vperm.xlu0 %807, %v153_v12  }
  0x11   :  { %172 = vperm.xlu1 %808, %v154_v13  }
  0x14   :  { %259 = vperm.xlu0 %807, %v684_v14  }
  0x15   :  { %264 = vperm.xlu1 %808, %v685_v15  }
  0x18   :  { %269 = vperm.xlu0 %807, %v686_v16  }
  0x19   :  { %274 = vperm.xlu1 %808, %v687_v17  }
  0x1c   :  { %360 = vperm.xlu0 %807, %v696_v18  }
  0x1d   :  { %365 = vperm.xlu1 %808, %v697_v19  }
  0x20   :  { %370 = vperm.xlu0 %807, %v698_v20  }
  0x21   :  { %375 = vperm.xlu1 %808, %v699_v21  }
  0x24   :  { %461 = vperm.xlu0 %807, %v708_v22  }
  0x25   :  { %466 = vperm.xlu1 %808, %v709_v23  }
  0x28   :  { %471 = vperm.xlu0 %807, %v710_v24  }
  0x29   :  { %476 = vperm.xlu1 %808, %v711_v25  }
  0x2c   :  { %660 = vperm.xlu0 %807, %v657_v26  }
  0x83   :  { %v44_v29 = vpop.permute.xlu0 %43 }
  0x84   :  { %v54_v28 = vpop.permute.xlu1 %53 }
  0x87   :  { %v49_v34 = vpop.permute.xlu0 %48 }
  0x88   :  { %v59_v32 = vpop.permute.xlu1 %58 }
  0x8b   :  { %v158_v45 = vpop.permute.xlu0 %157 }
  0x8c   :  { %v163_v44 = vpop.permute.xlu1 %162 }
  0x8f   :  { %v168_v51 = vpop.permute.xlu0 %167 }
  0x90   :  { %v173_v48 = vpop.permute.xlu1 %172 }
  0x93   :  { %v260_v0 = vpop.permute.xlu0 %259 }
  0x94   :  { %v265_v1 = vpop.permute.xlu1 %264 }
  0x97   :  { %v270_v2 = vpop.permute.xlu0 %269 }
  0x98   :  { %v275_v6 = vpop.permute.xlu1 %274 }
  0xe1   :  { %v754_v30 = vpop.f32.mrb[0].mxu0 }
  0xe2   :  { %v130_v31 = vpop.f32.mrb[1].mxu0  ;;  %v139_v35 = vadd.f32 %v754_v30, %v54_v28  ;;  %v819_v28 = vld [vmem:[%s1031_s3 + $0x28] sm:$0xff]   ;;  %v855_v30 = vmov 0.0  }
  0xe3   :  { %v755_v33 = vpop.f32.mrb[2].mxu0  ;;  %v131_v38 = vadd.f32 %v130_v31, %v44_v29  ;;  %v820_v29 = vld [vmem:[%s1031_s3 + $0x30] sm:$0xff]   ;;  %v366_v31 = vpop.permute.xlu1 %365 }
  0xe4   :  { %v142_v36 = vadd.f32 %v755_v33, %v59_v32  ;;  %v133_v37 = vpop.f32.mrb[3].mxu0  ;;  %v361_v32 = vpop.permute.xlu0 %360 }
  0xe5   :  { %v134_v39 = vadd.f32 %v133_v37, %v49_v34 }
  0xe6   :  { %v150_v40 = vpack.c.bf16 %v142_v36, %v139_v35 }
  0xe7   :  { %v149_v41 = vpack.c.bf16 %v134_v39, %v131_v38  ;;  %v376_v35 = vpop.permute.xlu1 %375 }
  0xe8   :  { %v371_v38 = vpop.permute.xlu0 %370 }
  0xe9   :  { %756 = vmatprep.subr.bf16.mxu1 %v149_v41 }
  0xea   :  { %757 = vmatpush3.bf16.msra.mxu1 %v149_v41 }
  0xeb   :  { %758 = vmatprep.subr.bf16.mxu1 %v150_v40 }
  0xee   :  { %759 = vmatpush3.bf16.msra.mxu1 %v150_v40 }
  0xf1   :  { %761 = vmatmul.mubr.msk.bf16.vlgmr.msra.gmra.mrb[0].mxu1 %vm185_vm1, %v815_v42 }
  0xf2   :  { %768 = vmatprep.mubr.msk.bf16.mxu1 %vm185_vm1, %v816_v43 }
 0x1c4   :  { %v762_v46 = vpop.f32.mrb[0].mxu1 }
 0x1c5   :  { %v226_v47 = vpop.f32.mrb[1].mxu1  ;;  %v235_v54 = vadd.f32 %v762_v46, %v168_v51  ;;  %v462_v51 = vpop.permute.xlu0 %461 }
 0x1c6   :  { %v227_v49 = vadd.f32 %v226_v47, %v158_v45  ;;  %v763_v50 = vpop.f32.mrb[2].mxu1 }
 0x1c7   :  { %v238_v52 = vadd.f32 %v763_v50, %v173_v48  ;;  %v229_v53 = vpop.f32.mrb[3].mxu1  ;;  %v568_v50 = vld [vmem:[%s1032_s5] sm:$0xf] }
 0x1c8   :  { %822 = vtanh.f32 %v227_v49  ;;  %v230_v55 = vadd.f32 %v229_v53, %v163_v44  ;;  %v821_v49 = vld [vmem:[%s1031_s3 + $0x38] sm:$0xff]  }
 0x1c9   :  { %824 = vtanh.f32 %v238_v52  ;;  %v467_v52 = vpop.permute.xlu1 %466  ;;  %v472_v53 = vpop.permute.xlu0 %471 }
 0x1ca   :  { %826 = vtanh.f32 %v230_v55 }
 0x1cb   :  { %828 = vtanh.f32 %v235_v54 }
 0x1d2   :  { %v823_v56 = vpop.eup %822 }
 0x1d3   :  { %v825_v57 = vpop.eup %824 }
 0x1d4   :  { %v827_v58 = vpop.eup %826 }
 0x1d5   :  { %v250_v59 = vpack.c.bf16 %v827_v58, %v823_v56  ;;  %v829_v60 = vpop.eup %828 }
 0x1d6   :  { %v251_v61 = vpack.c.bf16 %v825_v57, %v829_v60 }
 0x1d7   :  { %764 = vmatprep.subr.bf16.mxu1 %v250_v59 }
 0x1d8   :  { %765 = vmatpush3.bf16.msra.mxu1 %v250_v59 }
 0x1d9   :  { %766 = vmatprep.subr.bf16.mxu1 %v251_v61 }
 0x1dc   :  { %767 = vmatpush3.bf16.msra.mxu1 %v251_v61 }
 0x1df   :  { %769 = vmatmul.mubr.msk.bf16.vlgmr.msra.gmra.mrb[4].mxu1 %vm185_vm1, %v817_v62 }
 0x1e0   :  { %784 = vmatprep.mubr.msk.bf16.mxu1 %vm185_vm1, %v820_v29 }
 0x2b2   :  { %v770_v3 = vpop.f32.mrb[4].mxu1 }
 0x2b3   :  { %v336_v4 = vadd.f32 %v770_v3, %v270_v2  ;;  %v327_v5 = vpop.f32.mrb[5].mxu1 }
 0x2b4   :  { %v328_v7 = vadd.f32 %v327_v5, %v260_v0  ;;  %v771_v8 = vpop.f32.mrb[6].mxu1 }
 0x2b5   :  { %830 = vtanh.f32 %v336_v4  ;;  %v339_v9 = vadd.f32 %v771_v8, %v275_v6  ;;  %v330_v10 = vpop.f32.mrb[7].mxu1 }
 0x2b6   :  { %832 = vtanh.f32 %v328_v7  ;;  %v331_v11 = vadd.f32 %v330_v10, %v265_v1 }
 0x2b7   :  { %834 = vtanh.f32 %v339_v9 }
 0x2b8   :  { %836 = vtanh.f32 %v331_v11 }
 0x2bf   :  { %v831_v12 = vpop.eup %830 }
 0x2c0   :  { %v833_v13 = vpop.eup %832  ;;  %v550_v14 = vadd.f32 %v831_v12, %v829_v60 }
 0x2c1   :  { %v835_v15 = vpop.eup %834  ;;  %v548_v16 = vadd.f32 %v833_v13, %v823_v56 }
 0x2c2   :  { %v837_v17 = vpop.eup %836  ;;  %v352_v18 = vpack.c.bf16 %v835_v15, %v831_v12  ;;  %v551_v19 = vadd.f32 %v835_v15, %v825_v57  ;;  %v554_v22 = vmul.f32 0.5, %v550_v14  ;;  %v477_v57 = vpop.permute.xlu1 %476 }
 0x2c3   :  { %v351_v20 = vpack.c.bf16 %v837_v17, %v833_v13  ;;  %v549_v21 = vadd.f32 %v837_v17, %v827_v58  ;;  %v552_v24 = vmul.f32 0.5, %v548_v16  ;;  %v716_v13 = vld [vmem:[%s1032_s5 + $0x4] sm:$0xf] }
 0x2c4   :  { %v555_v23 = vmul.f32 0.5, %v551_v19 }
 0x2c5   :  { %772 = vmatprep.subr.bf16.mxu0 %v351_v20  ;;  %v553_v25 = vmul.f32 0.5, %v549_v21  ;;  %v661_v21 = vpop.permute.xlu0 %660 }
 0x2c6   :  { %773 = vmatpush3.bf16.msra.mxu0 %v351_v20  ;;  %v557_v26 = vpack.c.bf16 %v555_v23, %v554_v22 }
 0x2c7   :  { %774 = vmatprep.subr.bf16.mxu0 %v352_v18  ;;  %v556_v27 = vpack.c.bf16 %v553_v25, %v552_v24 }
 0x2ca   :  { %775 = vmatpush3.bf16.msra.mxu0 %v352_v18 }
 0x2cb   :  { %788 = vmatprep.subr.bf16.mxu0 %v855_v30 }
 0x2cd   :  { %777 = vmatmul.mubr.msk.bf16.vlgmr.msra.gmra.mrb[4].mxu0 %vm185_vm1, %v819_v28 }
 0x2ce   :  { %792 = vmatprep.mubr.msk.bf16.mxu0 %vm856_vm2, %v855_v30 }
 0x3a0   :  { %v778_v33 = vpop.f32.mrb[4].mxu0 }
 0x3a1   :  { %v428_v34 = vpop.f32.mrb[5].mxu0  ;;  %v437_v41 = vadd.f32 %v778_v33, %v371_v38 }
 0x3a2   :  { %v429_v36 = vadd.f32 %v428_v34, %v361_v32  ;;  %v779_v37 = vpop.f32.mrb[6].mxu0 }
 0x3a3   :  { %v440_v39 = vadd.f32 %v779_v37, %v376_v35  ;;  %v431_v40 = vpop.f32.mrb[7].mxu0 }
 0x3a4   :  { %838 = vtanh.f32 %v429_v36  ;;  %v432_v42 = vadd.f32 %v431_v40, %v366_v31 }
 0x3a5   :  { %840 = vtanh.f32 %v440_v39 }
 0x3a6   :  { %842 = vtanh.f32 %v432_v42 }
 0x3a7   :  { %844 = vtanh.f32 %v437_v41 }
 0x3ae   :  { %v839_v43 = vpop.eup %838 }
 0x3af   :  { %v841_v44 = vpop.eup %840 }
 0x3b0   :  { %v843_v45 = vpop.eup %842 }
 0x3b1   :  { %v452_v46 = vpack.c.bf16 %v843_v45, %v839_v43  ;;  %v845_v47 = vpop.eup %844 }
 0x3b2   :  { %v453_v48 = vpack.c.bf16 %v841_v44, %v845_v47 }
 0x3b3   :  { %780 = vmatprep.subr.bf16.mxu1 %v452_v46 }
 0x3b4   :  { %781 = vmatpush3.bf16.msra.mxu1 %v452_v46 }
 0x3b5   :  { %782 = vmatprep.subr.bf16.mxu1 %v453_v48 }
 0x3b8   :  { %783 = vmatpush3.bf16.msra.mxu1 %v453_v48 }
 0x3b9   :  { %796 = vmatprep.subr.bf16.mxu1 %v855_v30 }
 0x3bb   :  { %785 = vmatmul.mubr.msk.bf16.vlgmr.msra.gmra.mrb[8].mxu1 %vm185_vm1, %v821_v49 }
 0x3bc   :  { %797 = vmatpush3.bf16.msra.mxu1 %v556_v27  ;;  %800 = vmatprep.mubr.msk.bf16.mxu1 %vm856_vm2, %v855_v30 }
 0x3bd   :  { %798 = vmatprep.subr.bf16.mxu1 %v855_v30 }
 0x3c0   :  { %799 = vmatpush3.bf16.msra.mxu1 %v557_v26 }
 0x3c3   :  { %801 = vmatmul.mubr.msk.bf16.vlgmr.msra.gmra.mrb[12].mxu1 %vm185_vm1, %v568_v50 }
 0x48e   :  { %v786_v54 = vpop.f32.mrb[8].mxu1 }
 0x48f   :  { %v538_v55 = vadd.f32 %v786_v54, %v472_v53  ;;  %v529_v56 = vpop.f32.mrb[9].mxu1 }
 0x490   :  { %v530_v58 = vadd.f32 %v529_v56, %v462_v51  ;;  %v787_v59 = vpop.f32.mrb[10].mxu1 }
 0x491   :  { %846 = vtanh.f32 %v538_v55  ;;  %v541_v60 = vadd.f32 %v787_v59, %v477_v57  ;;  %v532_v61 = vpop.f32.mrb[11].mxu1 }
 0x492   :  { %848 = vtanh.f32 %v530_v58  ;;  %v533_v62 = vadd.f32 %v532_v61, %v467_v52 }
 0x493   :  { %850 = vtanh.f32 %v541_v60 }
 0x494   :  { %852 = vtanh.f32 %v533_v62 }
 0x496   :  { %v651_v14 = vpop.f32.mrb[12].mxu1 }
 0x497   :  { %v802_v15 = vpop.f32.mrb[13].mxu1 }
 0x498   :  { %v654_v16 = vpop.f32.mrb[14].mxu1 }
 0x499   :  { %v803_v17 = vpop.f32.mrb[15].mxu1 }
 0x49b   :  { %v847_v63 = vpop.eup %846 }
 0x49c   :  { %v849_v0 = vpop.eup %848  ;;  %v560_v1 = vadd.f32 %v847_v63, %v845_v47 }
 0x49d   :  { %v851_v2 = vpop.eup %850  ;;  %v558_v3 = vadd.f32 %v849_v0, %v839_v43 }
 0x49e   :  { %v853_v4 = vpop.eup %852  ;;  %v561_v5 = vadd.f32 %v851_v2, %v841_v44  ;;  %v564_v7 = vmul.f32 0.5, %v560_v1 }
 0x49f   :  { %v559_v6 = vadd.f32 %v853_v4, %v843_v45  ;;  %v562_v9 = vmul.f32 0.5, %v558_v3 }
 0x4a0   :  { %v565_v8 = vmul.f32 0.5, %v561_v5 }
 0x4a1   :  { %v563_v10 = vmul.f32 0.5, %v559_v6 }
 0x4a2   :  { %v567_v11 = vpack.c.bf16 %v565_v8, %v564_v7 }
 0x4a3   :  { %v566_v12 = vpack.c.bf16 %v563_v10, %v562_v9 }
 0x4a5   :  { %789 = vmatpush3.bf16.msra.mxu0 %v566_v12 }
 0x4a6   :  { %790 = vmatprep.subr.bf16.mxu0 %v855_v30 }
 0x4a9   :  { %791 = vmatpush3.bf16.msra.mxu0 %v567_v11 }
 0x4ac   :  { %793 = vmatmul.mubr.msk.bf16.vlgmr.msra.gmra.mrb[8].mxu0 %vm185_vm1, %v716_v13 }
 0x57f   :  { %v608_v18 = vpop.f32.mrb[8].mxu0 }
 0x580   :  { %v652_v19 = vadd.f32 %v651_v14, %v608_v18  ;;  %v794_v20 = vpop.f32.mrb[9].mxu0 }
 0x581   :  { %v611_v22 = vpop.f32.mrb[10].mxu0 }
 0x582   :  { %v663_v23 = vadd.f32 %v661_v21, %v652_v19  ;;  %v795_v24 = vpop.f32.mrb[11].mxu0 }
 0x584   :  { %664 = vst [vmem:[%s1033_s7] sm:$0xff] %v663_v23 }

</bundles_post_ra>
